<compile_context>
chip_gen: v7x
topology: tpu7x:2x2x1
jax: 0.10.0
libtpu: 0.0.40
codegen_flags: <defaults>
</compile_context>

<pallas_src>
from functools import lru_cache, partial

import numpy as np
import jax
import jax.numpy as jnp
from jax.experimental import pallas as pl
from jax.experimental.pallas import tpu as pltpu


# ----------------------------------------------------------------------------
# Pallas kernel: one temporal block -> (dc, reg) partial sums.
# ----------------------------------------------------------------------------
def _temporal_tv_kernel(xb_ref, xn_ref, bop_ref, m_ref, kp_ref, dc_ref, reg_ref):
    blk_t, h, w2 = xb_ref.shape
    w = w2 // 2

    xb = xb_ref[...]                                    # (blk_t, H, 2W) packed [re|im]

    # ---- data consistency: i2k along the last axis == one MXU matmul --------
    # TODO(synk): for large W on v6e/v7x, cast the matmul operands to bfloat16
    # (keep preferred_element_type=f32) once the per-shape tolerance is checked.
    x2 = xb.reshape(blk_t * h, w2)
    y2 = jnp.dot(x2, bop_ref[...], preferred_element_type=jnp.float32)
    y = y2.reshape(blk_t, h, w2)                        # [yr | yi]
    r = m_ref[...] * y - kp_ref[...]                    # mask broadcasts over H if slim
    dc_part = 0.5 * jnp.sum(r * r)

    # ---- temporal total variation -------------------------------------------
    # interior forward differences inside the block
    if blk_t > 1:
        d = xb[1:] - xb[:-1]                            # (blk_t-1, H, 2W)
        reg_part = jnp.sum(jnp.sqrt(d[..., :w] ** 2 + d[..., w:] ** 2))
    else:
        reg_part = jnp.float32(0.0)

    # boundary difference to the first frame of the next block (skip last block)
    db = xn_ref[0] - xb[blk_t - 1]                      # (H, 2W)
    bnd = jnp.sum(jnp.sqrt(db[..., :w] ** 2 + db[..., w:] ** 2))
    reg_part = reg_part + jnp.where(
        pl.program_id(0) < pl.num_programs(0) - 1, bnd, 0.0)

    # lane-dense per-block partial sums (reduced / combined in the wrapper)
    dc_ref[...] = jnp.full(dc_ref.shape, dc_part, jnp.float32)
    reg_ref[...] = jnp.full(reg_ref.shape, reg_part, jnp.float32)


# ----------------------------------------------------------------------------
# Host-side helpers.
# ----------------------------------------------------------------------------
@lru_cache(maxsize=None)
def _i2k_block_operator(n):
    """Realified (2n, 2n) operator B with [xr|xi] @ B == [Re y | Im y], where
    y = fftshift(fft(ifftshift(x, -1), -1, norm='ortho'), -1).  Built once per
    n on the host (no per-call FFT-of-identity on device)."""
    eye = np.eye(n, dtype=np.complex64)
    m = np.fft.fftshift(
        np.fft.fft(np.fft.ifftshift(eye, axes=0), axis=0, norm="ortho"), axes=0)
    mt = m.T
    fr = np.real(mt).astype(np.float32)
    fi = np.imag(mt).astype(np.float32)
    top = np.concatenate([fr, fi], axis=1)
    bot = np.concatenate([-fi, fr], axis=1)
    return jnp.asarray(np.concatenate([top, bot], axis=0))   # (2n, 2n) f32


def _pick_block_frames(T, H, W, requested=None):
    """Largest divisor of T whose block keeps ~<=2 MiB of x resident."""
    bytes_per_frame = H * 2 * W * 4
    cap = max(1, (2 * 1024 * 1024) // bytes_per_frame)
    if requested is not None:
        cap = min(cap, int(requested))
    cap = max(1, min(cap, T))
    bf = 1
    for d in range(1, cap + 1):
        if T % d == 0:
            bf = d
    return bf


@partial(jax.jit, static_argnames=("block_frames",))
def _temporal_tv_loss(kernel_c, mask, ksp_c, lam, bop, block_frames):
    T, H, W = kernel_c.shape
    bf = block_frames
    nb = T // bf
    w2 = 2 * W

    # planar-packed f32 views; fused by XLA inside this jit.
    # TODO(synk): consume complex64 directly via an in-kernel bitcast to skip
    # this packing pass entirely.
    xp = jnp.concatenate(
        [jnp.real(kernel_c), jnp.imag(kernel_c)], axis=-1).astype(jnp.float32)
    kp = jnp.concatenate(
        [jnp.real(ksp_c), jnp.imag(ksp_c)], axis=-1).astype(jnp.float32)

    m = mask
    if m.ndim == 2:
        m = m[:, None, :]
    if m.ndim != 3 or m.shape[1] not in (1, H):
        raise ValueError(f"mask shape {mask.shape} not broadcastable to {(T, H, W)}")
    m = m.astype(jnp.float32)
    mp = jnp.concatenate([m, m], axis=-1)               # (T, Hm, 2W), Hm in {1, H}
    hm = mp.shape[1]

    dc_out, reg_out = pl.pallas_call(
        _temporal_tv_kernel,
        out_shape=(jax.ShapeDtypeStruct((nb, 8, 128), jnp.float32),
                   jax.ShapeDtypeStruct((nb, 8, 128), jnp.float32)),
        grid=(nb,),
        in_specs=[
            # x block (bf frames)
            pl.BlockSpec((bf, H, w2), lambda b: (b, 0, 0)),
            # first frame of the next block (for the boundary TV term)
            pl.BlockSpec((1, H, w2),
                         lambda b: (jnp.minimum((b + 1) * bf, T - 1), 0, 0)),
            # realified DFT operator: constant index -> stays resident in VMEM
            pl.BlockSpec((w2, w2), lambda b: (0, 0)),
            # slim sampling mask
            pl.BlockSpec((bf, hm, w2), lambda b: (b, 0, 0)),
            # measured k-space
            pl.BlockSpec((bf, H, w2), lambda b: (b, 0, 0)),
        ],
        out_specs=(pl.BlockSpec((1, 8, 128), lambda b: (b, 0, 0)),
                   pl.BlockSpec((1, 8, 128), lambda b: (b, 0, 0))),
        compiler_params=pltpu.CompilerParams(
            dimension_semantics=("parallel",),
            vmem_limit_bytes=32 * 1024 * 1024),
    )(xp, xp, bop, mp, kp)

    dc = jnp.sum(dc_out[:, 0, 0])
    reg = jnp.sum(reg_out[:, 0, 0])
    # loss = dc_loss * +reg_loss * lambda  (product, exactly as written in PyTorch)
    return dc * reg * lam


def temporal_tv_forward(kernel_c, mask, ksp_c, lam, block_frames=None):
    """Returns (recons, loss) exactly like TemporalTV.forward()."""
    T, H, W = kernel_c.shape
    bf = _pick_block_frames(T, H, W, block_frames)
    bop = _i2k_block_operator(W)
    loss = _temporal_tv_loss(kernel_c, mask, ksp_c,
                             jnp.asarray(lam, jnp.float32), bop, bf)
    recons = kernel_c[None]                              # recons.unsqueeze(0)
    return recons, loss


# ----------------------------------------------------------------------------
# Pure-JAX reference (correctness check of the Pallas kernel).
# ----------------------------------------------------------------------------
def _reference_loss(kernel_c, mask, ksp_c, lam):
    y = jnp.fft.fftshift(
        jnp.fft.fft(jnp.fft.ifftshift(kernel_c, axes=-1), axis=-1, norm="ortho"),
        axes=-1)
    m = mask if mask.ndim == 3 else mask[:, None, :]
    dc = 0.5 * jnp.sum(jnp.abs(m * y - ksp_c) ** 2)
    d = kernel_c[1:] - kernel_c[:-1]
    reg = jnp.sum(jnp.abs(d))
    return dc * reg * lam


if __name__ == "__main__":
    # Small shapes consistent with the module: zf / ksp are (T, H, W) complex,
    # mask is a per-frame k-space sampling mask broadcast over H.
    T, H, W = 8, 16, 16
    lam = 0.1

    key = jax.random.PRNGKey(0)
    k0, k1, k2, k3, k4 = jax.random.split(key, 5)

    zf = (jax.random.normal(k0, (T, H, W), jnp.float32)
          + 1j * jax.random.normal(k1, (T, H, W), jnp.float32)).astype(jnp.complex64)
    ksp = (jax.random.normal(k2, (T, H, W), jnp.float32)
           + 1j * jax.random.normal(k3, (T, H, W), jnp.float32)).astype(jnp.complex64)
    mask = (jax.random.uniform(k4, (T, 1, W)) > 0.5).astype(jnp.float32)

    ref = _reference_loss(zf, mask, ksp, lam)

    # multi-block (grid of 2, interior + boundary TV), per-frame blocks, single block
    for bf in (4, 1, None):
        recons, loss = temporal_tv_forward(zf, mask, ksp, lam, block_frames=bf)
        recons, loss = jax.block_until_ready((recons, loss))
        assert recons.shape == (1, T, H, W)
        assert jnp.allclose(loss, ref, rtol=2e-3, atol=1e-3), (bf, loss, ref)

    print("KERNEL_OK")
</pallas_src>

<mosaic_0001>
module attributes {stable_mosaic.version = 11 : i64} {
  func.func @_temporal_tv_kernel(%arg0: i32, %arg1: memref<4x16x32xf32, #tpu.memory_space<vmem>>, %arg2: memref<1x16x32xf32, #tpu.memory_space<vmem>>, %arg3: memref<32x32xf32, #tpu.memory_space<vmem>>, %arg4: memref<4x1x32xf32, #tpu.memory_space<vmem>>, %arg5: memref<4x16x32xf32, #tpu.memory_space<vmem>>, %arg6: memref<1x8x128xf32, #tpu.memory_space<vmem>>, %arg7: memref<1x8x128xf32, #tpu.memory_space<vmem>>) attributes {dimension_semantics = [#tpu.dimension_semantics<parallel>], iteration_bounds = array<i64: 2>, scalar_prefetch = 0 : i64, scratch_operands = 0 : i64, tpu.core_type = #tpu.core_type<tc>, window_params = [{transform_indices = @transform_0, window_bounds = array<i64: 4, 16, 32>}, {transform_indices = @transform_1, window_bounds = array<i64: 1, 16, 32>}, {pipeline_mode = #tpu.pipeline_mode<synchronous>, transform_indices = @transform_2, window_bounds = array<i64: 32, 32>}, {transform_indices = @transform_3, window_bounds = array<i64: 4, 1, 32>}, {transform_indices = @transform_4, window_bounds = array<i64: 4, 16, 32>}, {transform_indices = @transform_5, window_bounds = array<i64: 1, 8, 128>}, {transform_indices = @transform_6, window_bounds = array<i64: 1, 8, 128>}]} {
    %c0 = arith.constant 0 : index
    %c0_0 = arith.constant 0 : index
    %c0_1 = arith.constant 0 : index
    %0 = vector.load %arg1[%c0, %c0_0, %c0_1] : memref<4x16x32xf32, #tpu.memory_space<vmem>>, vector<4x16x32xf32>
    %1 = vector.shape_cast %0 : vector<4x16x32xf32> to vector<64x32xf32>
    %c0_2 = arith.constant 0 : index
    %c0_3 = arith.constant 0 : index
    %2 = vector.load %arg3[%c0_2, %c0_3] : memref<32x32xf32, #tpu.memory_space<vmem>>, vector<32x32xf32>
    %cst = arith.constant dense<0.000000e+00> : vector<64x32xf32>
    %3 = tpu.matmul %1, %2, %cst {dimension_numbers = #tpu.dot_dimension_numbers<[1], [0], [0], [1], [0, 0, 1, 1], [], []>} : vector<64x32xf32>, vector<32x32xf32>, vector<64x32xf32> -> vector<64x32xf32>
    %4 = vector.shape_cast %3 : vector<64x32xf32> to vector<4x16x32xf32>
    %c0_4 = arith.constant 0 : index
    %c0_5 = arith.constant 0 : index
    %c0_6 = arith.constant 0 : index
    %5 = vector.load %arg4[%c0_4, %c0_5, %c0_6] : memref<4x1x32xf32, #tpu.memory_space<vmem>>, vector<4x1x32xf32>
    %6 = vector.broadcast %5 : vector<4x1x32xf32> to vector<4x16x32xf32>
    %7 = arith.mulf %6, %4 : vector<4x16x32xf32>
    %c0_7 = arith.constant 0 : index
    %c0_8 = arith.constant 0 : index
    %c0_9 = arith.constant 0 : index
    %8 = vector.load %arg5[%c0_7, %c0_8, %c0_9] : memref<4x16x32xf32, #tpu.memory_space<vmem>>, vector<4x16x32xf32>
    %9 = arith.subf %7, %8 : vector<4x16x32xf32>
    %10 = arith.mulf %9, %9 : vector<4x16x32xf32>
    %11 = vector.shape_cast %10 : vector<4x16x32xf32> to vector<1x4x16x32xf32>
    %cst_10 = arith.constant dense<0.000000e+00> : vector<1xf32>
    %12 = vector.multi_reduction <add>, %11, %cst_10 [1, 2, 3] : vector<1x4x16x32xf32> to vector<1xf32>
    %13 = vector.shape_cast %12 : vector<1xf32> to vector<1x1x1x1xf32>
    %14 = vector.extract %13[0, 0, 0, 0] : f32 from vector<1x1x1x1xf32>
    %cst_11 = arith.constant 5.000000e-01 : f32
    %15 = arith.mulf %cst_11, %14 : f32
    %16 = vector.extract_strided_slice %0 {offsets = [1, 0, 0], sizes = [3, 16, 32], strides = [1, 1, 1]} : vector<4x16x32xf32> to vector<3x16x32xf32>
    %17 = vector.extract_strided_slice %0 {offsets = [0, 0, 0], sizes = [3, 16, 32], strides = [1, 1, 1]} : vector<4x16x32xf32> to vector<3x16x32xf32>
    %18 = arith.subf %16, %17 : vector<3x16x32xf32>
    %19 = vector.extract_strided_slice %18 {offsets = [0, 0, 0], sizes = [3, 16, 16], strides = [1, 1, 1]} : vector<3x16x32xf32> to vector<3x16x16xf32>
    %20 = arith.mulf %19, %19 : vector<3x16x16xf32>
    %21 = vector.extract_strided_slice %18 {offsets = [0, 0, 16], sizes = [3, 16, 16], strides = [1, 1, 1]} : vector<3x16x32xf32> to vector<3x16x16xf32>
    %22 = arith.mulf %21, %21 : vector<3x16x16xf32>
    %23 = arith.addf %20, %22 : vector<3x16x16xf32>
    %24 = math.sqrt %23 : vector<3x16x16xf32>
    %25 = vector.shape_cast %24 : vector<3x16x16xf32> to vector<1x3x16x16xf32>
    %cst_12 = arith.constant dense<0.000000e+00> : vector<1xf32>
    %26 = vector.multi_reduction <add>, %25, %cst_12 [1, 2, 3] : vector<1x3x16x16xf32> to vector<1xf32>
    %27 = vector.shape_cast %26 : vector<1xf32> to vector<1x1x1x1xf32>
    %28 = vector.extract %27[0, 0, 0, 0] : f32 from vector<1x1x1x1xf32>
    %c0_13 = arith.constant 0 : index
    %c0_14 = arith.constant 0 : index
    %c0_15 = arith.constant 0 : index
    %29 = vector.load %arg2[%c0_13, %c0_14, %c0_15] : memref<1x16x32xf32, #tpu.memory_space<vmem>>, vector<1x16x32xf32>
    %30 = vector.shape_cast %29 : vector<1x16x32xf32> to vector<16x32xf32>
    %31 = vector.extract_strided_slice %0 {offsets = [3, 0, 0], sizes = [1, 16, 32], strides = [1, 1, 1]} : vector<4x16x32xf32> to vector<1x16x32xf32>
    %32 = vector.shape_cast %31 : vector<1x16x32xf32> to vector<16x32xf32>
    %33 = arith.subf %30, %32 : vector<16x32xf32>
    %34 = vector.extract_strided_slice %33 {offsets = [0, 0], sizes = [16, 16], strides = [1, 1]} : vector<16x32xf32> to vector<16x16xf32>
    %35 = arith.mulf %34, %34 : vector<16x16xf32>
    %36 = vector.extract_strided_slice %33 {offsets = [0, 16], sizes = [16, 16], strides = [1, 1]} : vector<16x32xf32> to vector<16x16xf32>
    %37 = arith.mulf %36, %36 : vector<16x16xf32>
    %38 = arith.addf %35, %37 : vector<16x16xf32>
    %39 = math.sqrt %38 : vector<16x16xf32>
    %40 = vector.shape_cast %39 : vector<16x16xf32> to vector<1x16x16xf32>
    %cst_16 = arith.constant dense<0.000000e+00> : vector<1xf32>
    %41 = vector.multi_reduction <add>, %40, %cst_16 [1, 2] : vector<1x16x16xf32> to vector<1xf32>
    %42 = vector.shape_cast %41 : vector<1xf32> to vector<1x1x1xf32>
    %43 = vector.extract %42[0, 0, 0] : f32 from vector<1x1x1xf32>
    %c1_i32 = arith.constant 1 : i32
    %44 = arith.cmpi slt, %arg0, %c1_i32 : i32
    %cst_17 = arith.constant 0.000000e+00 : f32
    %45 = arith.select %44, %43, %cst_17 : f32
    %46 = arith.addf %28, %45 : f32
    %47 = vector.broadcast %15 : f32 to vector<1x8x128xf32>
    %c0_18 = arith.constant 0 : index
    %c0_19 = arith.constant 0 : index
    %c0_20 = arith.constant 0 : index
    %48 = vector.load %arg6[%c0_18, %c0_19, %c0_20] : memref<1x8x128xf32, #tpu.memory_space<vmem>>, vector<1x8x128xf32>
    tpu.vector_store %arg6[%c0_18, %c0_19, %c0_20], %47 {strides = array<i32>} : memref<1x8x128xf32, #tpu.memory_space<vmem>>, vector<1x8x128xf32>,
    %49 = vector.broadcast %46 : f32 to vector<1x8x128xf32>
    %c0_21 = arith.constant 0 : index
    %c0_22 = arith.constant 0 : index
    %c0_23 = arith.constant 0 : index
    %50 = vector.load %arg7[%c0_21, %c0_22, %c0_23] : memref<1x8x128xf32, #tpu.memory_space<vmem>>, vector<1x8x128xf32>
    tpu.vector_store %arg7[%c0_21, %c0_22, %c0_23], %49 {strides = array<i32>} : memref<1x8x128xf32, #tpu.memory_space<vmem>>, vector<1x8x128xf32>,
    return
  }
  func.func @transform_0(%arg0: i32) -> (i32, i32, i32) {
    %c0_i32 = arith.constant 0 : i32
    %c0_i32_0 = arith.constant 0 : i32
    %c0_i32_1 = arith.constant 0 : i32
    return %arg0, %c0_i32, %c0_i32_0 : i32, i32, i32
  }
  func.func @transform_1(%arg0: i32) -> (i32, i32, i32) {
    %c1_i32 = arith.constant 1 : i32
    %0 = arith.addi %arg0, %c1_i32 : i32
    %c4_i32 = arith.constant 4 : i32
    %1 = arith.muli %0, %c4_i32 : i32
    %c7_i32 = arith.constant 7 : i32
    %2 = arith.minsi %1, %c7_i32 : i32
    %c0_i32 = arith.constant 0 : i32
    %c0_i32_0 = arith.constant 0 : i32
    %c0_i32_1 = arith.constant 0 : i32
    return %2, %c0_i32, %c0_i32_0 : i32, i32, i32
  }
  func.func @transform_2(%arg0: i32) -> (i32, i32) {
    %c0_i32 = arith.constant 0 : i32
    %c0_i32_0 = arith.constant 0 : i32
    %c0_i32_1 = arith.constant 0 : i32
    return %c0_i32, %c0_i32_0 : i32, i32
  }
  func.func @transform_3(%arg0: i32) -> (i32, i32, i32) {
    %c0_i32 = arith.constant 0 : i32
    %c0_i32_0 = arith.constant 0 : i32
    %c0_i32_1 = arith.constant 0 : i32
    return %arg0, %c0_i32, %c0_i32_0 : i32, i32, i32
  }
  func.func @transform_4(%arg0: i32) -> (i32, i32, i32) {
    %c0_i32 = arith.constant 0 : i32
    %c0_i32_0 = arith.constant 0 : i32
    %c0_i32_1 = arith.constant 0 : i32
    return %arg0, %c0_i32, %c0_i32_0 : i32, i32, i32
  }
  func.func @transform_5(%arg0: i32) -> (i32, i32, i32) {
    %c0_i32 = arith.constant 0 : i32
    %c0_i32_0 = arith.constant 0 : i32
    %c0_i32_1 = arith.constant 0 : i32
    return %arg0, %c0_i32, %c0_i32_0 : i32, i32, i32
  }
  func.func @transform_6(%arg0: i32) -> (i32, i32, i32) {
    %c0_i32 = arith.constant 0 : i32
    %c0_i32_0 = arith.constant 0 : i32
    %c0_i32_1 = arith.constant 0 : i32
    return %arg0, %c0_i32, %c0_i32_0 : i32, i32, i32
  }
}

</mosaic_0001>

<bundles_post_ra>
// kernel: custom-call
= control target key start
LH: loop header
LB: loop body
LE: loop exit
PB: predicated region body
PF: predicated region fallthrough
CT: control target
= control target key end

     0   :  { %2 = vsyncpa [#allocation0], 0  ;;  %s61_s0 = inlined_call_operand.hbm [shape: c64[8,16,16], index: 0, kind: input, shape index: {}]   ;;  %s62_s1 = inlined_call_operand.vmem [shape: f32[8,16,16], index: 1, kind: output, shape index: {}]  }
   0x1   :  { %s3_s8 = sshll.u32 %s62_s1, 4  ;;  %s9_s11 = scalar_lea.hbm %s61_s0, 2048  ;;  %s4_s8 = int_to_ptr.vmem [resolvable:$true] %s3_s8 }
   0x2   :  { %p10_p0 = scmp.ne.s32.totalorder %s61_s0, %s9_s11  ;;  %s11_s16 = scalar_lea.hbm %s61_s0, 4096 }
   0x3   :  { %p12_p1 = scmp.lt.u32.totalorder %s11_s16, %s9_s11  ;;  %p13_p2 = scmp.lt.u32.totalorder %s9_s11, %s61_s0 }
   0x5   :  { %p14_p3 = por %p13_p2, %p12_p1 }
   0x7   :  { %p15_p4 = pnand %p14_p3, %p10_p0 }
   0x9   :  { %18 = shalt.err (!%p15_p4)  }
   0xa   :  { %s19_s1 = scalar_lea.vmem %s4_s8, 2048  ;;  %p24_p6 = scmp.lt.s32.totalorder %s4_s8, %s4_s8 }
   0xb   :  { %p20_p5 = scmp.ne.s32.totalorder %s4_s8, %s19_s1  ;;  %p25_p7 = scmp.lt.s32.totalorder %s19_s1, %s19_s1 }
   0xd   :  { %p26_p8 = por %p25_p7, %p24_p6 }
   0xf   :  { %p27_p9 = pnand %p26_p8, %p20_p5 }
  0x11   :  { %30 = shalt.err (!%p27_p9)  }
  0x12   :  { %6 = dma.hbm_to_vmem [thread:$0]  %s61_s0, 2048, %s4_s8, [#allocation0] }
  0x13   :  { %31 = dma.done.wait [#allocation0], 2048  }
  0x14   :  { %32 = vsyncadd [#allocation0], 4294965248 }
  0x15   :  { %8 = vsyncpa [#allocation0], 1 }

// kernel: custom-call.1
= control target key start
LH: loop header
LB: loop body
LE: loop exit
PB: predicated region body
PF: predicated region fallthrough
CT: control target
= control target key end

     0   :  { %s59_s0 = inlined_call_operand.hbm [shape: c64[8,16,16], index: 0, kind: input, shape index: {}]   ;;  %s60_s1 = inlined_call_operand.vmem [shape: f32[8,16,16], index: 1, kind: output, shape index: {}]  }
   0x1   :  { %s2_s8 = scalar_lea.hbm %s59_s0, 2048 }
   0x2   :  { %3 = vsyncpa [#allocation0], 0  ;;  %s4_s11 = sshll.u32 %s60_s1, 4  ;;  %s34_s14 = scalar_lea.hbm %s59_s0, 4096  ;;  %s5_s11 = int_to_ptr.vmem [resolvable:$true] %s4_s11 }
   0x3   :  { %p11_p0 = scmp.ne.s32.totalorder %s2_s8, %s34_s14  ;;  %p13_p1 = scmp.lt.u32.totalorder %s2_s8, %s59_s0 }
   0x4   :  { %p14_p2 = scmp.lt.u32.totalorder %s34_s14, %s34_s14  ;;  %p16_p4 = scmp.lt.u32.totalorder %s34_s14, %s2_s8 }
   0x6   :  { %p15_p3 = por %p14_p2, %p13_p1 }
   0x8   :  { %p17_p5 = por %p16_p4, %p15_p3 }
   0xa   :  { %p18_p6 = pnand %p17_p5, %p11_p0 }
   0xc   :  { %21 = shalt.err (!%p18_p6)  }
   0xd   :  { %s22_s17 = scalar_lea.vmem %s5_s11, 2048  ;;  %p27_p8 = scmp.lt.s32.totalorder %s5_s11, %s5_s11 }
   0xe   :  { %p23_p7 = scmp.ne.s32.totalorder %s5_s11, %s22_s17  ;;  %p28_p9 = scmp.lt.s32.totalorder %s22_s17, %s22_s17 }
  0x10   :  { %p29_p10 = por %p28_p9, %p27_p8 }
  0x12   :  { %p30_p11 = pnand %p29_p10, %p23_p7 }
  0x14   :  { %33 = shalt.err (!%p30_p11)  }
  0x15   :  { %7 = dma.hbm_to_vmem [thread:$0]  %s2_s8, 2048, %s5_s11, [#allocation0] }
  0x16   :  { %35 = dma.done.wait [#allocation0], 2048  }
  0x17   :  { %36 = vsyncadd [#allocation0], 4294965248 }
  0x18   :  { %9 = vsyncpa [#allocation0], 1 }

// kernel: _temporal_tv_loss.1
= control target key start
LH: loop header
LB: loop body
LE: loop exit
PB: predicated region body
PF: predicated region fallthrough
CT: control target
= control target key end

     0   :  { %s1020_s21 = smov 0   ;;  %s1142_s0 = inlined_call_operand.vmem [shape: f32[8,16,32], index: 0, kind: input, shape index: {}, may-alias: {0,1}]   ;;  %s1143_s1 = inlined_call_operand.vmem [shape: f32[8,16,32], index: 1, kind: input, shape index: {}, may-alias: {0,1}]   ;;  %s1144_s2 = inlined_call_operand.vmem [shape: f32[32,32], index: 2, kind: input, shape index: {}]   ;;  %s1145_s3 = inlined_call_operand.vmem [shape: f32[8,1,32], index: 3, kind: input, shape index: {}]   ;;  %s1146_s4 = inlined_call_operand.vmem [shape: f32[8,16,32], index: 4, kind: input, shape index: {}]   ;;  %s1147_s5 = inlined_call_operand.vmem [shape: f32[2,8,128], index: 5, kind: output, shape index: {0}]   ;;  %s1148_s6 = inlined_call_operand.vmem [shape: f32[2,8,128], index: 6, kind: output, shape index: {1}]  }
   0x1 LB: > { %s1026_s22 = sadd.s32 4294967295, %s982_s21   ;;  %p862_p0 = scmp.ge.s32.totalorder %s982_s21, 1  ;;  %s982_s21 = sphi %s1020_s21, %s17_s21  }
   0x2   : > { %p265_p1 = scmp.lt.s32.totalorder %s982_s21, 3 }
   0x4   : > { %p266_p2 = pnand %p862_p0, %p265_p1 }
   0x5   : > { %v366_v0 = vld [vmem:[%s1144_s2] sm:$0xff] (!%p266_p2)  ;;  %v367_v1 = vld [vmem:[%s1144_s2 + $0x8] sm:$0xff] (!%p266_p2)  ;;  %v368_v2 = vld [vmem:[%s1144_s2 + $0x10] sm:$0xff] (!%p266_p2)  ;;  %s863_s29 = sshll.u32 (!%p266_p2), %s1026_s22, 2  ;;  %vm370_vm0 = vcmask (!%p266_p2), 261120   ;;  %s984_s18 = smov (!%p266_p2), 112  }
   0x6   : > { %269 = sbr.rel (%p266_p2) target bundleno = 467 (0x1d3), region = 40  ;;  %v933_v3 = vpack.c.bf16 (!%p266_p2), %v367_v1, %v366_v0  ;;  %v369_v4 = vld [vmem:[%s1144_s2 + $0x18] sm:$0xff] (!%p266_p2)  ;;  %p319_p3 = scmp.lt.s32.totalorder (!%p266_p2), %s863_s29, 7  ;;  %vm669_vm5 = vcmask (!%p266_p2), 130048  }
   0x7   : > { %s898_s8 = sadd.s32 (!%p266_p2), 4, %s863_s29  ;;  %v937_v5 = vpack.c.bf16 (!%p266_p2), %v369_v4, %v368_v2  ;;  %p350_p5 = scmp.lt.s32.totalorder (!%p266_p2), %s1026_s22, 1 }
   0x8   : > { %p1043_p4 = scmp.lt.s32.totalorder (!%p266_p2), %s898_s8, 7  ;;  %934 = vmatprep.subr.bf16.mxu0 (!%p266_p2), %v933_v3  ;;  %941 = vmatprep.subr.bf16.mxu1 (!%p266_p2), %v933_v3 }
   0x9   : > { %936 = vmatpush3.bf16.msra.mxu0 (!%p266_p2), %v933_v3  ;;  %943 = vmatpush3.bf16.msra.mxu1 (!%p266_p2), %v933_v3 }
   0xa   : > { %938 = vmatprep.subr.bf16.mxu0 (!%p266_p2), %v937_v5  ;;  %942 = vmatprep.subr.bf16.mxu1 (!%p266_p2), %v937_v5 }
   0xd   : > { %s1151_s29 = smov (!%p319_p3, %s863_s29), 7  ;;  %s1153_s8 = smov (!%p1043_p4, %s898_s8), 7  ;;  %940 = vmatpush3.bf16.msra.mxu0 %v937_v5  ;;  %944 = vmatpush3.bf16.msra.mxu1 %v937_v5 }
   0xe   : > { %s896_s10 = sshll.u32 %s1151_s29, 4  ;;  %s1155_s8 = smov (!%p1043_p4, %s1153_s8), 7 }
   0xf   : > { %s323_s13 = scalar_lea.vmem %s1142_s0, %s896_s10  ;;  %s899_s14 = sshll.u32 %s1155_s8, 4 }
  0x10   : > { %v358_v6 = vld [vmem:[%s323_s13] sm:$0xff]  ;;  %v360_v7 = vld [vmem:[%s323_s13 + $0x10] sm:$0xff]  ;;  %v359_v9 = vld [vmem:[%s323_s13 + $0x8] sm:$0xff]  ;;  %s333_s17 = scalar_lea.vmem %s1143_s1, %s899_s14  ;;  %s341_s23 = scalar_lea.vmem %s1145_s3, %s1151_s29 }
  0x11   : > { %921 = vmatprep.mubr.msk.f32.mxu0 %vm370_vm0, %v358_v6  ;;  %v585_v8 = vsub.f32 %v360_v7, %v358_v6  ;;  %v361_v10 = vld [vmem:[%s323_s13 + $0x18] sm:$0xff]  ;;  %v362_v11 = vld [vmem:[%s323_s13 + $0x20] sm:$0xff]  ;;  %v363_v12 = vld [vmem:[%s323_s13 + $0x28] sm:$0xff]  ;;  %s1099_s26 = scalar_lea.vmem %s1146_s4, %s896_s10  ;;  %s1157_s22 = smov (!%p350_p5, %s1026_s22), 1 }
  0x12   : > { %927 = vmatprep.mubr.msk.f32.mxu1 %vm370_vm0, %v362_v11  ;;  %v587_v13 = vsub.f32 %v362_v11, %v360_v7  ;;  %v586_v14 = vsub.f32 %v361_v10, %v359_v9  ;;  %v364_v15 = vld [vmem:[%s323_s13 + $0x30] sm:$0xff]  ;;  %v588_v17 = vsub.f32 %v363_v12, %v361_v10  ;;  %922 = vmatmul.mubr.msk.f32.vlgmr.msra.gmra.mrb[0].mxu0 %vm370_vm0, %v359_v9  ;;  %v365_v19 = vld [vmem:[%s323_s13 + $0x38] sm:$0xff]  ;;  %v690_v24 = vld [vmem:[%s333_s17] sm:$0xff]  ;;  %s876_s27 = sshll.u32 %s1157_s22, 3 }
  0x13   : > { %v591_v16 = vmul.f32 %v585_v8, %v585_v8  ;;  %924 = vmatprep.mubr.msk.f32.mxu0 %vm370_vm0, %v360_v7  ;;  %928 = vmatmul.mubr.msk.f32.vlgmr.msra.gmra.mrb[0].mxu1 %vm370_vm0, %v363_v12  ;;  %v589_v21 = vsub.f32 %v364_v15, %v362_v11  ;;  %v590_v23 = vsub.f32 %v365_v19, %v363_v12  ;;  %v691_v25 = vld [vmem:[%s333_s17 + $0x8] sm:$0xff]  ;;  %s353_s7 = scalar_lea.vmem %s1147_s5, %s876_s27  ;;  %s357_s13 = scalar_lea.vmem %s1148_s6, %s876_s27 }
  0x14   : > { %v593_v18 = vmul.f32 %v587_v13, %v587_v13  ;;  %930 = vmatprep.mubr.msk.f32.mxu1 %vm370_vm0, %v364_v15  ;;  %v592_v20 = vmul.f32 %v586_v14, %v586_v14  ;;  %v594_v22 = vmul.f32 %v588_v17, %v588_v17  ;;  %v692_v27 = vsub.f32 %v690_v24, %v364_v15 }
  0x15   : > { %603 = vrot.lane.b32.xlu0 %v591_v16, %s984_s18  ;;  %v595_v26 = vmul.f32 %v589_v21, %v589_v21  ;;  %v596_v28 = vmul.f32 %v590_v23, %v590_v23  ;;  %v693_v29 = vsub.f32 %v691_v25, %v365_v19  ;;  %v886_v25 = vld [vmem:[%s341_s23] ss:$0 sm:$0xff] }
  0x16   : > { %607 = vrot.lane.b32.xlu1 %v593_v18, %s984_s18  ;;  %925 = vmatmul.mubr.msk.f32.gmra.mrb[2].mxu0 %vm370_vm0, %v361_v10  ;;  %v1070_v30 = vmul.f32 %v692_v27, %v692_v27 }
  0x17   : > { %931 = vmatmul.mubr.msk.f32.gmra.mrb[2].mxu1 %vm370_vm0, %v365_v19  ;;  %v1072_v31 = vmul.f32 %v693_v29, %v693_v29 }
  0x19   : > { %605 = vrot.lane.b32.xlu0 %v592_v20, %s984_s18 }
  0x1a   : > { %609 = vrot.lane.b32.xlu1 %v594_v22, %s984_s18 }
  0x1d   : > { %611 = vrot.lane.b32.xlu0 %v595_v26, %s984_s18 }
  0x1e   : > { %613 = vrot.lane.b32.xlu1 %v596_v28, %s984_s18 }
  0x21   : > { %698 = vrot.lane.b32.xlu0 %v1070_v30, %s984_s18 }
  0x22   : > { %700 = vrot.lane.b32.xlu1 %v1072_v31, %s984_s18 }
  0x87   : > { %v604_v32 = vpop.permute.xlu0 %603 }
  0x88   : > { %v621_v33 = vadd.f32 %v604_v32, %v591_v16  ;;  %v608_v34 = vpop.permute.xlu1 %607 }
  0x89   : > { %v623_v35 = vadd.f32 %v608_v34, %v593_v18 }
  0x8a   : > { %960 = vrsqrt.f32 %v621_v33  ;;  %vm629_vm1 = vcmp.eq.f32.partialorder %v621_v33, inf  ;;  %v632_v45 = vand.u32 2147483648, %v621_v33  ;;  %vm631_vm2 = vcmp.eq.f32.partialorder %v621_v33, 0.0 }
  0x8b   : > { %962 = vrsqrt.f32 %v623_v35  ;;  %v606_v36 = vpop.permute.xlu0 %605  ;;  %vm643_vm3 = vcmp.eq.f32.partialorder %v623_v35, inf  ;;  %v646_v49 = vand.u32 2147483648, %v623_v35  ;;  %vm645_vm4 = vcmp.eq.f32.partialorder %v623_v35, 0.0 }
  0x8c   : > { %v622_v37 = vadd.f32 %v606_v36, %v592_v20  ;;  %v610_v38 = vpop.permute.xlu1 %609 }
  0x8d   : > { %v624_v39 = vadd.f32 %v610_v38, %v594_v22  ;;  %v540_v38 = vld [vmem:[%s1099_s26 + $0x20] sm:$0xff] }
  0x8e   : > { %964 = vrsqrt.f32 %v622_v37  ;;  %vm636_vm6 = vcmp.eq.f32.partialorder %v622_v37, inf  ;;  %v639_v53 = vand.u32 2147483648, %v622_v37  ;;  %vm638_vm7 = vcmp.eq.f32.partialorder %v622_v37, 0.0 }
  0x8f   : > { %966 = vrsqrt.f32 %v624_v39  ;;  %v612_v40 = vpop.permute.xlu0 %611  ;;  %vm650_vm8 = vcmp.eq.f32.partialorder %v624_v39, inf  ;;  %v653_v57 = vand.u32 2147483648, %v624_v39  ;;  %vm652_vm9 = vcmp.eq.f32.partialorder %v624_v39, 0.0 }
  0x90   : > { %v625_v41 = vadd.f32 %v612_v40, %v595_v26  ;;  %v614_v42 = vpop.permute.xlu1 %613  ;;  %v888_v26 = vld [vmem:[%s341_s23 + $0x2] ss:$0 sm:$0xff] }
  0x91   : > { %v626_v43 = vadd.f32 %v614_v42, %v596_v28  ;;  %v537_v28 = vld [vmem:[%s1099_s26 + $0x8] sm:$0xff] }
  0x92   : > { %968 = vrsqrt.f32 %v625_v41  ;;  %vm657_vm10 = vcmp.eq.f32.partialorder %v625_v41, inf  ;;  %vm659_vm11 = vcmp.eq.f32.partialorder %v625_v41, 0.0  ;;  %v660_v61 = vand.u32 2147483648, %v625_v41 }
  0x93   : > { %970 = vrsqrt.f32 %v626_v43  ;;  %vm664_vm12 = vcmp.eq.f32.partialorder %v626_v43, inf  ;;  %v667_v2 = vand.u32 2147483648, %v626_v43  ;;  %vm666_vm13 = vcmp.eq.f32.partialorder %v626_v43, 0.0  ;;  %v699_v21 = vpop.permute.xlu0 %698 }
  0x94   : > { %v961_v44 = vpop.eup %960  ;;  %v701_v22 = vpop.permute.xlu1 %700  ;;  %v1085_v23 = vadd.f32 %v699_v21, %v1070_v30 }
  0x95   : > { %v963_v46 = vpop.eup %962  ;;  %v628_v47 = vmul.f32 %v961_v44, %v621_v33  ;;  %v1092_v24 = vadd.f32 %v701_v22, %v1072_v31  ;;  %v536_v31 = vld [vmem:[%s1099_s26] sm:$0xff]  ;;  %v539_v44 = vld [vmem:[%s1099_s26 + $0x18] sm:$0xff] }
  0x96   : > { %v642_v48 = vmul.f32 %v963_v46, %v623_v35  ;;  %972 = vrsqrt.f32 %v1085_v23  ;;  %vm708_vm14 = vcmp.eq.f32.partialorder %v1085_v23, inf }
  0x97   : > { %v630_v50 = vsel %vm629_vm1, %v621_v33, %v628_v47  ;;  %974 = vrsqrt.f32 %v1092_v24  ;;  %v541_v33 = vld [vmem:[%s1099_s26 + $0x28] sm:$0xff]  ;;  %vm715_vm15 = vcmp.eq.f32.partialorder %v1092_v24, inf  ;;  %vm710_vm1 = vcmp.eq.f32.partialorder %v1085_v23, 0.0 }
  0x98   : > { %v965_v51 = vpop.eup %964  ;;  %v633_v52 = vsel %vm631_vm2, %v632_v45, %v630_v50  ;;  %v644_v54 = vsel %vm643_vm3, %v623_v35, %v642_v48  ;;  %v887_v35 = vld [vmem:[%s341_s23 + $0x1] ss:$0 sm:$0xff]  ;;  %vm717_vm2 = vcmp.eq.f32.partialorder %v1092_v24, 0.0 }
  0x99   : > { %v967_v55 = vpop.eup %966  ;;  %v635_v56 = vmul.f32 %v965_v51, %v622_v37  ;;  %v647_v58 = vsel %vm645_vm4, %v646_v49, %v644_v54  ;;  %v670_v62 = vsel %vm669_vm5, %v633_v52, 0.0  ;;  %v538_v49 = vld [vmem:[%s1099_s26 + $0x10] sm:$0xff]  ;;  %v543_v52 = vld [vmem:[%s1099_s26 + $0x38] sm:$0xff] }
  0x9a   : > { %v649_v59 = vmul.f32 %v967_v55, %v624_v39  ;;  %v673_v7 = vsel %vm669_vm5, %v647_v58, 0.0 }
  0x9b   : > { %v637_v60 = vsel %vm636_vm6, %v622_v37, %v635_v56 }
  0x9c   : > { %v969_v63 = vpop.eup %968  ;;  %v640_v0 = vsel %vm638_vm7, %v639_v53, %v637_v60  ;;  %v651_v1 = vsel %vm650_vm8, %v624_v39, %v649_v59 }
  0x9d   : > { %v971_v3 = vpop.eup %970  ;;  %v654_v4 = vsel %vm652_vm9, %v653_v57, %v651_v1  ;;  %v656_v5 = vmul.f32 %v969_v63, %v625_v41  ;;  %v671_v6 = vsel %vm669_vm5, %v640_v0, 0.0  ;;  %v542_v57 = vld [vmem:[%s1099_s26 + $0x30] sm:$0xff] }
  0x9e   : > { %v663_v8 = vmul.f32 %v971_v3, %v626_v43  ;;  %v672_v9 = vadd.f32 %v671_v6, %v670_v62  ;;  %v675_v11 = vsel %vm669_vm5, %v654_v4, 0.0 }
  0x9f   : > { %v658_v10 = vsel %vm657_vm10, %v625_v41, %v656_v5  ;;  %v889_v41 = vld [vmem:[%s341_s23 + $0x3] ss:$0 sm:$0xff] }
  0xa0   : > { %v661_v12 = vsel %vm659_vm11, %v660_v61, %v658_v10  ;;  %v665_v13 = vsel %vm664_vm12, %v626_v43, %v663_v8  ;;  %v674_v14 = vadd.f32 %v673_v7, %v672_v9  ;;  %v973_v0 = vpop.eup %972 }
  0xa1   : > { %v668_v15 = vsel %vm666_vm13, %v667_v2, %v665_v13  ;;  %v677_v16 = vsel %vm669_vm5, %v661_v12, 0.0  ;;  %v975_v3 = vpop.eup %974  ;;  %v707_v9 = vmul.f32 %v973_v0, %v1085_v23 }
  0xa2   : > { %v676_v17 = vadd.f32 %v675_v11, %v674_v14  ;;  %v679_v18 = vsel %vm669_vm5, %v668_v15, 0.0  ;;  %v714_v10 = vmul.f32 %v975_v3, %v1092_v24 }
  0xa4   : > { %v678_v19 = vadd.f32 %v677_v16, %v676_v17  ;;  %v711_v16 = vand.u32 2147483648, %v1085_v23 }
  0xa6   : > { %v680_v20 = vadd.f32 %v679_v18, %v678_v19  ;;  %v709_v18 = vsel %vm708_vm14, %v1085_v23, %v707_v9  ;;  %v718_v19 = vand.u32 2147483648, %v1092_v24 }
  0xa8   : > { %681 = vadd.xlane.f32.xlu1 %v680_v20 }
  0xe5   : > { %v923_v27 = vpop.f32.mrb[0].mxu0 }
  0xe6   : > { %v529_v29 = vmul.f32 %v923_v27, %v886_v25  ;;  %v461_v30 = vpop.f32.mrb[1].mxu0  ;;  %v929_v32 = vpop.f32.mrb[0].mxu1 }
  0xe7   : > { %v528_v34 = vmul.f32 %v886_v25, %v461_v30  ;;  %v533_v36 = vmul.f32 %v929_v32, %v888_v26  ;;  %v481_v37 = vpop.f32.mrb[1].mxu1  ;;  %v716_v25 = vsel %vm715_vm15, %v1092_v24, %v714_v10 }
  0xe8   : > { %v545_v39 = vsub.f32 %v529_v29, %v537_v28  ;;  %v532_v40 = vmul.f32 %v888_v26, %v481_v37  ;;  %v712_v28 = vsel %vm710_vm1, %v711_v16, %v709_v18  ;;  %v719_v29 = vsel %vm717_vm2, %v718_v19, %v716_v25 }
  0xe9   : > { %v544_v42 = vsub.f32 %v528_v34, %v536_v31  ;;  %v926_v43 = vpop.f32.mrb[2].mxu0  ;;  %v549_v45 = vsub.f32 %v533_v36, %v541_v33  ;;  %v720_v23 = vsel %vm669_vm5, %v712_v28, 0.0  ;;  %v721_v32 = vsel %vm669_vm5, %v719_v29, 0.0 }
  0xea   : > { %v553_v46 = vmul.f32 %v545_v39, %v545_v39  ;;  %v531_v47 = vmul.f32 %v926_v43, %v887_v35  ;;  %v471_v48 = vpop.f32.mrb[3].mxu0  ;;  %v548_v50 = vsub.f32 %v532_v40, %v540_v38  ;;  %v932_v51 = vpop.f32.mrb[2].mxu1  ;;  %v722_v33 = vadd.f32 %v721_v32, %v720_v23 }
  0xeb   : > { %v552_v53 = vmul.f32 %v544_v42, %v544_v42  ;;  %v530_v54 = vmul.f32 %v887_v35, %v471_v48  ;;  %v535_v55 = vmul.f32 %v932_v51, %v889_v41  ;;  %v491_v56 = vpop.f32.mrb[3].mxu1  ;;  %v557_v12 = vmul.f32 %v549_v45, %v549_v45 }
  0xec   : > { %v561_v58 = vsel %vm370_vm0, %v553_v46, 0.0  ;;  %v547_v59 = vsub.f32 %v531_v47, %v539_v44  ;;  %v534_v60 = vmul.f32 %v889_v41, %v491_v56  ;;  %v556_v6 = vmul.f32 %v548_v50, %v548_v50 }
  0xed   : > { %v560_v61 = vsel %vm370_vm0, %v552_v53, 0.0  ;;  %v546_v62 = vsub.f32 %v530_v54, %v538_v49  ;;  %v551_v63 = vsub.f32 %v535_v55, %v543_v52  ;;  %v569_v20 = vsel %vm370_vm0, %v557_v12, 0.0 }
  0xee   : > { %v562_v1 = vadd.f32 %v561_v58, %v560_v61  ;;  %v550_v2 = vsub.f32 %v534_v60, %v542_v57  ;;  %v555_v4 = vmul.f32 %v547_v59, %v547_v59  ;;  %v567_v13 = vsel %vm370_vm0, %v556_v6, 0.0 }
  0xef   : > { %v554_v5 = vmul.f32 %v546_v62, %v546_v62  ;;  %v559_v21 = vmul.f32 %v551_v63, %v551_v63 }
  0xf0   : > { %v565_v11 = vsel %vm370_vm0, %v555_v4, 0.0  ;;  %v558_v14 = vmul.f32 %v550_v2, %v550_v2 }
  0xf1   : > { %v563_v7 = vsel %vm370_vm0, %v554_v5, 0.0  ;;  %v573_v30 = vsel %vm370_vm0, %v559_v21, 0.0 }
  0xf2   : > { %v564_v8 = vadd.f32 %v563_v7, %v562_v1  ;;  %v571_v22 = vsel %vm370_vm0, %v558_v14, 0.0 }
  0xf4   : > { %v566_v15 = vadd.f32 %v565_v11, %v564_v8 }
  0xf6   : > { %v568_v17 = vadd.f32 %v567_v13, %v566_v15 }
  0xf8   : > { %v570_v26 = vadd.f32 %v569_v20, %v568_v17 }
  0xfa   : > { %v572_v27 = vadd.f32 %v571_v22, %v570_v26 }
  0xfc   : > { %v574_v31 = vadd.f32 %v573_v30, %v572_v27 }
  0xfe   : > { %575 = vadd.xlane.f32.xlu0 %v574_v31 }
 0x102   : > { %723 = vadd.xlane.f32.xlu0 %v722_v33 }
 0x135   : > { %v682_v34 = vpop.xlane.xlu1 %681 }
 0x136   : > { %v683_v35 = vrot.slane %v682_v34, 4 }
 0x138   : > { %v684_v36 = vadd.f32 %v683_v35, %v682_v34 }
 0x13a   : > { %v685_v37 = vrot.slane %v684_v36, 2 }
 0x13c   : > { %v686_v40 = vadd.f32 %v685_v37, %v684_v36 }
 0x13e   : > { %v687_v46 = vrot.slane %v686_v40, 1 }
 0x140   : > { %v688_v51 = vadd.f32 %v687_v46, %v686_v40 }
 0x18b   : > { %v576_v38 = vpop.xlane.xlu0 %575 }
 0x18c   : > { %v577_v24 = vrot.slane %v576_v38, 4 }
 0x18e   : > { %v578_v39 = vadd.f32 %v577_v24, %v576_v38 }
 0x18f   : > { %v724_v41 = vpop.xlane.xlu0 %723 }
 0x190   : > { %v579_v42 = vrot.slane %v578_v39, 2  ;;  %v725_v43 = vrot.slane %v724_v41, 4 }
 0x192   : > { %v726_v44 = vadd.f32 %v725_v43, %v724_v41  ;;  %v580_v45 = vadd.f32 %v579_v42, %v578_v39 }
 0x194   : > { %v727_v47 = vrot.slane %v726_v44, 2  ;;  %v581_v48 = vrot.slane %v580_v45, 1 }
 0x196   : > { %v728_v49 = vadd.f32 %v727_v47, %v726_v44  ;;  %v582_v50 = vadd.f32 %v581_v48, %v580_v45 }
 0x198   : > { %945 = vpush %v582_v50  ;;  %v729_v52 = vrot.slane %v728_v49, 1 }
 0x199   : > { %947 = vpush %v688_v51 }
 0x19a   : > { %v730_v53 = vadd.f32 %v729_v52, %v728_v49 }
 0x19c   : > { %949 = vpush %v730_v53 }
 0x1c9   : > { %s946_s28 = spop %945 }
 0x1ca   : > { %s584_s8 = smul.f32 0.5, %s946_s28  ;;  %s948_s9 = spop %947 }
 0x1cc   : > { %v735_v54 = vstv %s584_s8 }
 0x1cd   : > { %736 = vst [vmem:[%s353_s7] sm:$0xff] %v735_v54  ;;  %s950_s10 = spop %949 }
 0x1ce   : > { %s1159_s10 = smov (!%p350_p5, %s950_s10), 0.0 }
 0x1cf   : > { %s734_s14 = sadd.f32 %s948_s9, %s1159_s10 }
 0x1d1   : > { %v737_v55 = vstv %s734_s14 }
 0x1d2   : > { %738 = vst [vmem:[%s357_s13] sm:$0xff] %v737_v55 }
 0x1d3 PF: > { %s17_s21 = sadd.s32 1, %s982_s21  }
 0x1d4   : > { %p14_p6 = scmp.ge.s32.totalorder %s17_s21, 4  }
 0x1d6   :  { %16 = sbr.rel (!%p14_p6) target bundleno = 1 (0x1), region = 91 }

</bundles_post_ra>
